<compile_context>
chip_gen: v5e
topology: v5e:2x2
jax: 0.10.0
libtpu: 0.0.40
codegen_flags: <defaults>
</compile_context>

<pallas_src>
import functools

import jax
import jax.numpy as jnp
from jax import lax
from jax.experimental import pallas as pl
from jax.experimental.pallas import tpu as pltpu


def small_basic_block_kernel(x_ref, w1_ref, b1_ref, w2_ref, b2_ref,
                             w3_ref, b3_ref, w4_ref, b4_ref, o_ref,
                             *, H, W, HW, L):
    """One grid step: B images folded into lanes.

    x_ref block: (Cin, L) with L = B*HW;  o_ref block: (Cout, L).
    Weights are bf16 (Cout, K); biases are f32 (Cout, 1).
    """
    x = x_ref[...]                                   # (Cin, L) f32

    # Lane-position masks (loop-invariant, no integer div/mod when power-of-2).
    pos = lax.broadcasted_iota(jnp.int32, (1, L), 1)
    if (HW & (HW - 1)) == 0:
        local = jnp.bitwise_and(pos, HW - 1)          # position within an image
    else:
        local = pos % HW
    if (W & (W - 1)) == 0:
        col = jnp.bitwise_and(local, W - 1)           # column within a row
    else:
        col = local % W
    top_edge = local < W                              # h == 0
    bot_edge = local >= HW - W                        # h == H-1
    lft_edge = col == 0                               # w == 0
    rgt_edge = col == W - 1                           # w == W-1

    def mm(w_ref, a, b_ref):
        # bf16 operands on the MXU, f32 accumulate, f32 bias add on the VPU.
        return jnp.dot(w_ref[...], a.astype(jnp.bfloat16),
                       preferred_element_type=jnp.float32) + b_ref[...]

    # ---- conv1: 1x1 + ReLU  ->  (Cm, L) ----------------------------------
    y1 = jnp.maximum(mm(w1_ref, x, b1_ref), 0.0)

    # ---- conv2: (3,1) kernel, pad (1,0) over H, + ReLU --------------------
    # taps kh=0,1,2 use rows h-1, h, h+1 (flat lane offsets -W, 0, +W).
    top = jnp.where(top_edge, 0.0, pltpu.roll(y1, shift=W,     axis=1))
    bot = jnp.where(bot_edge, 0.0, pltpu.roll(y1, shift=L - W, axis=1))
    x2 = jnp.concatenate([top, y1, bot], axis=0)      # (3*Cm, L)
    y2 = jnp.maximum(mm(w2_ref, x2, b2_ref), 0.0)

    # ---- conv3: (1,3) kernel, pad (0,1) over W, + ReLU --------------------
    # taps kw=0,1,2 use cols w-1, w, w+1 (flat lane offsets -1, 0, +1).
    lft = jnp.where(lft_edge, 0.0, pltpu.roll(y2, shift=1,     axis=1))
    rgt = jnp.where(rgt_edge, 0.0, pltpu.roll(y2, shift=L - 1, axis=1))
    x3 = jnp.concatenate([lft, y2, rgt], axis=0)      # (3*Cm, L)
    y3 = jnp.maximum(mm(w3_ref, x3, b3_ref), 0.0)

    # ---- conv4: 1x1 -------------------------------------------------------
    o_ref[...] = mm(w4_ref, y3, b4_ref)


def _choose_batch_per_step(N, HW):
    """Largest B | N that widens lanes toward ~2048 while keeping >=2 steps."""
    lane_target = 2048
    best = 1
    for B in range(1, N + 1):
        if N % B != 0:
            continue
        if B * HW > lane_target:
            break
        if (N // B) >= 2 or N == 1:
            best = B
    return best


def small_basic_block_forward(x_nchw, kparams, *, batch_per_step=None):
    """x_nchw: (N, Cin, H, W) float32. Returns (N, Cout, H, W) float32."""
    (w1, b1, w2s, b2, w3s, b3, w4, b4) = kparams
    N, Cin, H, W = x_nchw.shape
    HW = H * W
    Cout = w4.shape[0]

    B = _choose_batch_per_step(N, HW) if batch_per_step is None else batch_per_step
    assert N % B == 0
    G = N // B
    L = B * HW

    # Fold batch into the lane axis: (N, Cin, H, W) -> (Cin, N*HW).
    x = jnp.transpose(x_nchw.reshape(N, Cin, HW), (1, 0, 2)).reshape(Cin, N * HW)

    kern = functools.partial(small_basic_block_kernel, H=H, W=W, HW=HW, L=L)
    out = pl.pallas_call(
        kern,
        out_shape=jax.ShapeDtypeStruct((Cout, N * HW), jnp.float32),
        grid=(G,),
        in_specs=[
            pl.BlockSpec((Cin, L), lambda g: (0, g)),
            pl.BlockSpec(w1.shape,  lambda g: (0, 0)),
            pl.BlockSpec(b1.shape,  lambda g: (0, 0)),
            pl.BlockSpec(w2s.shape, lambda g: (0, 0)),
            pl.BlockSpec(b2.shape,  lambda g: (0, 0)),
            pl.BlockSpec(w3s.shape, lambda g: (0, 0)),
            pl.BlockSpec(b3.shape,  lambda g: (0, 0)),
            pl.BlockSpec(w4.shape,  lambda g: (0, 0)),
            pl.BlockSpec(b4.shape,  lambda g: (0, 0)),
        ],
        out_specs=pl.BlockSpec((Cout, L), lambda g: (0, g)),
        compiler_params=pltpu.CompilerParams(
            dimension_semantics=("parallel",),
            vmem_limit_bytes=32 * 1024 * 1024),
    )(x, w1, b1, w2s, b2, w3s, b3, w4, b4)

    # (Cout, N*HW) -> (N, Cout, H, W)
    return jnp.transpose(out.reshape(Cout, N, HW), (1, 0, 2)).reshape(N, Cout, H, W)


# ------------------------- parameter construction --------------------------

def init_params(key, ch_in, ch_out):
    """Deterministic synthetic weights in PyTorch OIHW layout (f32)."""
    cm = ch_out // 4
    ks = jax.random.split(key, 8)
    s = 0.1
    w1 = jax.random.normal(ks[0], (cm, ch_in, 1, 1), jnp.float32) * s
    b1 = jax.random.normal(ks[1], (cm,), jnp.float32) * s
    w2 = jax.random.normal(ks[2], (cm, cm, 3, 1), jnp.float32) * s
    b2 = jax.random.normal(ks[3], (cm,), jnp.float32) * s
    w3 = jax.random.normal(ks[4], (cm, cm, 1, 3), jnp.float32) * s
    b3 = jax.random.normal(ks[5], (cm,), jnp.float32) * s
    w4 = jax.random.normal(ks[6], (ch_out, cm, 1, 1), jnp.float32) * s
    b4 = jax.random.normal(ks[7], (ch_out,), jnp.float32) * s
    return (w1, b1, w2, b2, w3, b3, w4, b4)


def to_kernel_params(p):
    """OIHW weights -> kernel GEMM weights (Cout, K) in bf16; biases f32 (C,1).

    For the spatial convs the 3 taps are fused along K: stacked-activation row
    index is k*Cm + i, so W_stacked[o, k*Cm + i] = w[o, i, k].
    """
    (w1, b1, w2, b2, w3, b3, w4, b4) = p
    cm = w1.shape[0]
    kw1 = w1[:, :, 0, 0].astype(jnp.bfloat16)                                # (Cm, Cin)
    kw2 = jnp.transpose(w2[:, :, :, 0], (0, 2, 1)).reshape(cm, 3 * cm)       # (Cm, 3Cm)
    kw3 = jnp.transpose(w3[:, :, 0, :], (0, 2, 1)).reshape(cm, 3 * cm)       # (Cm, 3Cm)
    kw4 = w4[:, :, 0, 0].astype(jnp.bfloat16)                                # (Cout, Cm)
    return (kw1, b1[:, None], kw2.astype(jnp.bfloat16), b2[:, None],
            kw3.astype(jnp.bfloat16), b3[:, None], kw4, b4[:, None])


def ref_forward(x, p):
    """Pure-JAX f32 reference (NCHW), matches PyTorch Conv2d semantics."""
    (w1, b1, w2, b2, w3, b3, w4, b4) = p
    dn = ('NCHW', 'OIHW', 'NCHW')

    def conv(x, w, b, pad):
        y = lax.conv_general_dilated(x, w, (1, 1), pad, dimension_numbers=dn)
        return y + b[None, :, None, None]

    y = jax.nn.relu(conv(x, w1, b1, [(0, 0), (0, 0)]))
    y = jax.nn.relu(conv(y, w2, b2, [(1, 1), (0, 0)]))
    y = jax.nn.relu(conv(y, w3, b3, [(0, 0), (1, 1)]))
    return conv(y, w4, b4, [(0, 0), (0, 0)])


if __name__ == "__main__":
    ch_in, ch_out = 4, 32
    N, H, W = 2, 16, 16

    key = jax.random.PRNGKey(0)
    kx, kp = jax.random.split(key)
    x = jax.random.normal(kx, (N, ch_in, H, W), jnp.float32)

    torch_params = init_params(kp, ch_in, ch_out)
    kernel_params = to_kernel_params(torch_params)

    out = jax.block_until_ready(small_basic_block_forward(x, kernel_params))
    ref = jax.block_until_ready(ref_forward(x, torch_params))

    assert out.shape == (N, ch_out, H, W), out.shape
    # Tolerance loosened vs the pure-f32 version: MXU operands are bf16
    # (accumulation stays f32).
    max_err = float(jnp.max(jnp.abs(out - ref)))
    assert jnp.allclose(out, ref, atol=1e-2, rtol=1e-2), max_err

    print("KERNEL_OK")
</pallas_src>

<mosaic_0001>
module attributes {stable_mosaic.version = 11 : i64} {
  func.func @small_basic_block_kernel(%arg0: i32, %arg1: memref<4x256xf32, #tpu.memory_space<vmem>>, %arg2: memref<8x4xbf16, #tpu.memory_space<vmem>>, %arg3: memref<8x1xf32, #tpu.memory_space<vmem>>, %arg4: memref<8x24xbf16, #tpu.memory_space<vmem>>, %arg5: memref<8x1xf32, #tpu.memory_space<vmem>>, %arg6: memref<8x24xbf16, #tpu.memory_space<vmem>>, %arg7: memref<8x1xf32, #tpu.memory_space<vmem>>, %arg8: memref<32x8xbf16, #tpu.memory_space<vmem>>, %arg9: memref<32x1xf32, #tpu.memory_space<vmem>>, %arg10: memref<32x256xf32, #tpu.memory_space<vmem>>) attributes {dimension_semantics = [#tpu.dimension_semantics<parallel>], iteration_bounds = array<i64: 2>, scalar_prefetch = 0 : i64, scratch_operands = 0 : i64, tpu.core_type = #tpu.core_type<tc>, window_params = [{transform_indices = @transform_0, window_bounds = array<i64: 4, 256>}, {pipeline_mode = #tpu.pipeline_mode<synchronous>, transform_indices = @transform_1, window_bounds = array<i64: 8, 4>}, {pipeline_mode = #tpu.pipeline_mode<synchronous>, transform_indices = @transform_2, window_bounds = array<i64: 8, 1>}, {pipeline_mode = #tpu.pipeline_mode<synchronous>, transform_indices = @transform_3, window_bounds = array<i64: 8, 24>}, {pipeline_mode = #tpu.pipeline_mode<synchronous>, transform_indices = @transform_4, window_bounds = array<i64: 8, 1>}, {pipeline_mode = #tpu.pipeline_mode<synchronous>, transform_indices = @transform_5, window_bounds = array<i64: 8, 24>}, {pipeline_mode = #tpu.pipeline_mode<synchronous>, transform_indices = @transform_6, window_bounds = array<i64: 8, 1>}, {pipeline_mode = #tpu.pipeline_mode<synchronous>, transform_indices = @transform_7, window_bounds = array<i64: 32, 8>}, {pipeline_mode = #tpu.pipeline_mode<synchronous>, transform_indices = @transform_8, window_bounds = array<i64: 32, 1>}, {transform_indices = @transform_9, window_bounds = array<i64: 32, 256>}]} {
    %c0 = arith.constant 0 : index
    %c0_0 = arith.constant 0 : index
    %0 = vector.load %arg1[%c0, %c0_0] : memref<4x256xf32, #tpu.memory_space<vmem>>, vector<4x256xf32>
    %1 = tpu.iota {dimensions = array<i32: 1>} : vector<1x256xi32>
    %c255_i32 = arith.constant 255 : i32
    %2 = vector.broadcast %c255_i32 : i32 to vector<1x256xi32>
    %3 = arith.andi %1, %2 : vector<1x256xi32>
    %c15_i32 = arith.constant 15 : i32
    %4 = vector.broadcast %c15_i32 : i32 to vector<1x256xi32>
    %5 = arith.andi %3, %4 : vector<1x256xi32>
    %c16_i32 = arith.constant 16 : i32
    %6 = vector.broadcast %c16_i32 : i32 to vector<1x256xi32>
    %7 = arith.cmpi slt, %3, %6 : vector<1x256xi32>
    %c240_i32 = arith.constant 240 : i32
    %8 = vector.broadcast %c240_i32 : i32 to vector<1x256xi32>
    %9 = arith.cmpi sge, %3, %8 : vector<1x256xi32>
    %c0_i32 = arith.constant 0 : i32
    %10 = vector.broadcast %c0_i32 : i32 to vector<1x256xi32>
    %11 = arith.cmpi eq, %5, %10 : vector<1x256xi32>
    %c15_i32_1 = arith.constant 15 : i32
    %12 = vector.broadcast %c15_i32_1 : i32 to vector<1x256xi32>
    %13 = arith.cmpi eq, %5, %12 : vector<1x256xi32>
    %c0_2 = arith.constant 0 : index
    %c0_3 = arith.constant 0 : index
    %14 = vector.load %arg2[%c0_2, %c0_3] : memref<8x4xbf16, #tpu.memory_space<vmem>>, vector<8x4xbf16>
    %15 = arith.truncf %0 : vector<4x256xf32> to vector<4x256xbf16>
    %cst = arith.constant dense<0.000000e+00> : vector<8x256xf32>
    %16 = tpu.matmul %14, %15, %cst {dimension_numbers = #tpu.dot_dimension_numbers<[1], [0], [0], [1], [0, 0, 1, 1], [], []>} : vector<8x4xbf16>, vector<4x256xbf16>, vector<8x256xf32> -> vector<8x256xf32>
    %c0_4 = arith.constant 0 : index
    %c0_5 = arith.constant 0 : index
    %17 = vector.load %arg3[%c0_4, %c0_5] : memref<8x1xf32, #tpu.memory_space<vmem>>, vector<8x1xf32>
    %18 = vector.broadcast %17 : vector<8x1xf32> to vector<8x256xf32>
    %19 = arith.addf %16, %18 : vector<8x256xf32>
    %cst_6 = arith.constant 0.000000e+00 : f32
    %20 = vector.broadcast %cst_6 : f32 to vector<8x256xf32>
    %21 = arith.maximumf %19, %20 : vector<8x256xf32>
    %c16_i32_7 = arith.constant 16 : i32
    %22 = tpu.dynamic_rotate %21 by %c16_i32_7 dim 1 : vector<8x256xf32>, i32 -> vector<8x256xf32>
    %cst_8 = arith.constant 0.000000e+00 : f32
    %23 = vector.shape_cast %7 : vector<1x256xi1> to vector<1x256xi1>
    %24 = vector.broadcast %23 : vector<1x256xi1> to vector<8x256xi1>
    %25 = vector.broadcast %cst_8 : f32 to vector<8x256xf32>
    %26 = arith.select %24, %25, %22 : vector<8x256xi1>, vector<8x256xf32>
    %c240_i32_9 = arith.constant 240 : i32
    %27 = tpu.dynamic_rotate %21 by %c240_i32_9 dim 1 : vector<8x256xf32>, i32 -> vector<8x256xf32>
    %cst_10 = arith.constant 0.000000e+00 : f32
    %28 = vector.shape_cast %9 : vector<1x256xi1> to vector<1x256xi1>
    %29 = vector.broadcast %28 : vector<1x256xi1> to vector<8x256xi1>
    %30 = vector.broadcast %cst_10 : f32 to vector<8x256xf32>
    %31 = arith.select %29, %30, %27 : vector<8x256xi1>, vector<8x256xf32>
    %32 = tpu.concatenate %26, %21, %31 in 0 : vector<8x256xf32>, vector<8x256xf32>, vector<8x256xf32> -> vector<24x256xf32>
    %c0_11 = arith.constant 0 : index
    %c0_12 = arith.constant 0 : index
    %33 = vector.load %arg4[%c0_11, %c0_12] : memref<8x24xbf16, #tpu.memory_space<vmem>>, vector<8x24xbf16>
    %34 = arith.truncf %32 : vector<24x256xf32> to vector<24x256xbf16>
    %cst_13 = arith.constant dense<0.000000e+00> : vector<8x256xf32>
    %35 = tpu.matmul %33, %34, %cst_13 {dimension_numbers = #tpu.dot_dimension_numbers<[1], [0], [0], [1], [0, 0, 1, 1], [], []>} : vector<8x24xbf16>, vector<24x256xbf16>, vector<8x256xf32> -> vector<8x256xf32>
    %c0_14 = arith.constant 0 : index
    %c0_15 = arith.constant 0 : index
    %36 = vector.load %arg5[%c0_14, %c0_15] : memref<8x1xf32, #tpu.memory_space<vmem>>, vector<8x1xf32>
    %37 = vector.broadcast %36 : vector<8x1xf32> to vector<8x256xf32>
    %38 = arith.addf %35, %37 : vector<8x256xf32>
    %cst_16 = arith.constant 0.000000e+00 : f32
    %39 = vector.broadcast %cst_16 : f32 to vector<8x256xf32>
    %40 = arith.maximumf %38, %39 : vector<8x256xf32>
    %c1_i32 = arith.constant 1 : i32
    %41 = tpu.dynamic_rotate %40 by %c1_i32 dim 1 : vector<8x256xf32>, i32 -> vector<8x256xf32>
    %cst_17 = arith.constant 0.000000e+00 : f32
    %42 = vector.shape_cast %11 : vector<1x256xi1> to vector<1x256xi1>
    %43 = vector.broadcast %42 : vector<1x256xi1> to vector<8x256xi1>
    %44 = vector.broadcast %cst_17 : f32 to vector<8x256xf32>
    %45 = arith.select %43, %44, %41 : vector<8x256xi1>, vector<8x256xf32>
    %c255_i32_18 = arith.constant 255 : i32
    %46 = tpu.dynamic_rotate %40 by %c255_i32_18 dim 1 : vector<8x256xf32>, i32 -> vector<8x256xf32>
    %cst_19 = arith.constant 0.000000e+00 : f32
    %47 = vector.shape_cast %13 : vector<1x256xi1> to vector<1x256xi1>
    %48 = vector.broadcast %47 : vector<1x256xi1> to vector<8x256xi1>
    %49 = vector.broadcast %cst_19 : f32 to vector<8x256xf32>
    %50 = arith.select %48, %49, %46 : vector<8x256xi1>, vector<8x256xf32>
    %51 = tpu.concatenate %45, %40, %50 in 0 : vector<8x256xf32>, vector<8x256xf32>, vector<8x256xf32> -> vector<24x256xf32>
    %c0_20 = arith.constant 0 : index
    %c0_21 = arith.constant 0 : index
    %52 = vector.load %arg6[%c0_20, %c0_21] : memref<8x24xbf16, #tpu.memory_space<vmem>>, vector<8x24xbf16>
    %53 = arith.truncf %51 : vector<24x256xf32> to vector<24x256xbf16>
    %cst_22 = arith.constant dense<0.000000e+00> : vector<8x256xf32>
    %54 = tpu.matmul %52, %53, %cst_22 {dimension_numbers = #tpu.dot_dimension_numbers<[1], [0], [0], [1], [0, 0, 1, 1], [], []>} : vector<8x24xbf16>, vector<24x256xbf16>, vector<8x256xf32> -> vector<8x256xf32>
    %c0_23 = arith.constant 0 : index
    %c0_24 = arith.constant 0 : index
    %55 = vector.load %arg7[%c0_23, %c0_24] : memref<8x1xf32, #tpu.memory_space<vmem>>, vector<8x1xf32>
    %56 = vector.broadcast %55 : vector<8x1xf32> to vector<8x256xf32>
    %57 = arith.addf %54, %56 : vector<8x256xf32>
    %cst_25 = arith.constant 0.000000e+00 : f32
    %58 = vector.broadcast %cst_25 : f32 to vector<8x256xf32>
    %59 = arith.maximumf %57, %58 : vector<8x256xf32>
    %c0_26 = arith.constant 0 : index
    %c0_27 = arith.constant 0 : index
    %60 = vector.load %arg8[%c0_26, %c0_27] : memref<32x8xbf16, #tpu.memory_space<vmem>>, vector<32x8xbf16>
    %61 = arith.truncf %59 : vector<8x256xf32> to vector<8x256xbf16>
    %cst_28 = arith.constant dense<0.000000e+00> : vector<32x256xf32>
    %62 = tpu.matmul %60, %61, %cst_28 {dimension_numbers = #tpu.dot_dimension_numbers<[1], [0], [0], [1], [0, 0, 1, 1], [], []>} : vector<32x8xbf16>, vector<8x256xbf16>, vector<32x256xf32> -> vector<32x256xf32>
    %c0_29 = arith.constant 0 : index
    %c0_30 = arith.constant 0 : index
    %63 = vector.load %arg9[%c0_29, %c0_30] : memref<32x1xf32, #tpu.memory_space<vmem>>, vector<32x1xf32>
    %64 = vector.broadcast %63 : vector<32x1xf32> to vector<32x256xf32>
    %65 = arith.addf %62, %64 : vector<32x256xf32>
    %c0_31 = arith.constant 0 : index
    %c0_32 = arith.constant 0 : index
    %66 = vector.load %arg10[%c0_31, %c0_32] : memref<32x256xf32, #tpu.memory_space<vmem>>, vector<32x256xf32>
    tpu.vector_store %arg10[%c0_31, %c0_32], %65 {strides = array<i32>} : memref<32x256xf32, #tpu.memory_space<vmem>>, vector<32x256xf32>,
    return
  }
  func.func @transform_0(%arg0: i32) -> (i32, i32) {
    %c0_i32 = arith.constant 0 : i32
    %c0_i32_0 = arith.constant 0 : i32
    return %c0_i32, %arg0 : i32, i32
  }
  func.func @transform_1(%arg0: i32) -> (i32, i32) {
    %c0_i32 = arith.constant 0 : i32
    %c0_i32_0 = arith.constant 0 : i32
    %c0_i32_1 = arith.constant 0 : i32
    return %c0_i32, %c0_i32_0 : i32, i32
  }
  func.func @transform_2(%arg0: i32) -> (i32, i32) {
    %c0_i32 = arith.constant 0 : i32
    %c0_i32_0 = arith.constant 0 : i32
    %c0_i32_1 = arith.constant 0 : i32
    return %c0_i32, %c0_i32_0 : i32, i32
  }
  func.func @transform_3(%arg0: i32) -> (i32, i32) {
    %c0_i32 = arith.constant 0 : i32
    %c0_i32_0 = arith.constant 0 : i32
    %c0_i32_1 = arith.constant 0 : i32
    return %c0_i32, %c0_i32_0 : i32, i32
  }
  func.func @transform_4(%arg0: i32) -> (i32, i32) {
    %c0_i32 = arith.constant 0 : i32
    %c0_i32_0 = arith.constant 0 : i32
    %c0_i32_1 = arith.constant 0 : i32
    return %c0_i32, %c0_i32_0 : i32, i32
  }
  func.func @transform_5(%arg0: i32) -> (i32, i32) {
    %c0_i32 = arith.constant 0 : i32
    %c0_i32_0 = arith.constant 0 : i32
    %c0_i32_1 = arith.constant 0 : i32
    return %c0_i32, %c0_i32_0 : i32, i32
  }
  func.func @transform_6(%arg0: i32) -> (i32, i32) {
    %c0_i32 = arith.constant 0 : i32
    %c0_i32_0 = arith.constant 0 : i32
    %c0_i32_1 = arith.constant 0 : i32
    return %c0_i32, %c0_i32_0 : i32, i32
  }
  func.func @transform_7(%arg0: i32) -> (i32, i32) {
    %c0_i32 = arith.constant 0 : i32
    %c0_i32_0 = arith.constant 0 : i32
    %c0_i32_1 = arith.constant 0 : i32
    return %c0_i32, %c0_i32_0 : i32, i32
  }
  func.func @transform_8(%arg0: i32) -> (i32, i32) {
    %c0_i32 = arith.constant 0 : i32
    %c0_i32_0 = arith.constant 0 : i32
    %c0_i32_1 = arith.constant 0 : i32
    return %c0_i32, %c0_i32_0 : i32, i32
  }
  func.func @transform_9(%arg0: i32) -> (i32, i32) {
    %c0_i32 = arith.constant 0 : i32
    %c0_i32_0 = arith.constant 0 : i32
    return %c0_i32, %arg0 : i32, i32
  }
}

</mosaic_0001>

<bundles_post_ra>
// kernel: tpu_custom_call.1
= control target key start
LH: loop header
LB: loop body
LE: loop exit
PB: predicated region body
PF: predicated region fallthrough
CT: control target
= control target key end

     0   :  { %14 = vsyncpa [#allocation3], 0  ;;  %s1119_s0 = inlined_call_operand.vmem [shape: f32[4,512], index: 0, kind: input, shape index: {}]   ;;  %s1120_s1 = inlined_call_operand.vmem [shape: bf16[8,4], index: 1, kind: input, shape index: {}]   ;;  %s1121_s2 = inlined_call_operand.vmem [shape: f32[8,1], index: 2, kind: input, shape index: {}]   ;;  %s1122_s3 = inlined_call_operand.vmem [shape: bf16[8,24], index: 3, kind: input, shape index: {}]   ;;  %s1123_s4 = inlined_call_operand.vmem [shape: f32[8,1], index: 4, kind: input, shape index: {}]   ;;  %s1124_s5 = inlined_call_operand.vmem [shape: bf16[8,24], index: 5, kind: input, shape index: {}]   ;;  %s1125_s6 = inlined_call_operand.vmem [shape: f32[8,1], index: 6, kind: input, shape index: {}]   ;;  %s1126_s7 = inlined_call_operand.vmem [shape: bf16[32,8], index: 7, kind: input, shape index: {}]   ;;  %s1127_s8 = inlined_call_operand.vmem [shape: f32[32,1], index: 8, kind: input, shape index: {}]   ;;  %s1128_s9 = inlined_call_operand.hbm [shape: f32[32,512], index: 9, kind: output, shape index: {}]  }
   0x1   :  { %16 = vsyncpa [#allocation3 + $0x1], 0  ;;  %s972_s30 = smov 0   ;;  %s974_s10 = smov 0  }
   0x2   :  { %s976_s11 = smov 0   ;;  %s978_s12 = smov 0  }
   0x3 LB: > { %s993_s13 = sadd.s32 4294967295, %s912_s12   ;;  %s732_s14 = sadd.s32 4294967294, %s912_s12   ;;  %s912_s12 = sphi %s978_s12, %s1134_s12   ;;  %s908_s11 = sphi %s976_s11, %s1133_s11   ;;  %s904_s10 = sphi %s974_s10, %s1132_s10   ;;  %s900_s30 = sphi %s972_s30, %s1131_s30  }
   0x4   : > { %s997_s15 = sadd.s32 1, %s912_s12   ;;  %s223_s16 = sadd.s32 1, %s908_s11 }
   0x5   : > { %s220_s17 = ssub.s32 %s912_s12, %s997_s15  ;;  %p233_p0 = scmp.ne.s32.totalorder %s908_s11, %s904_s10 }
   0x6   : > { %p221_p1 = scmp.eq.s32.totalorder %s220_s17, 0  ;;  %p234_p2 = scmp.eq.s32.totalorder %s993_s13, 1 }
   0x7   : > { %p239_p3 = scmp.ne.s32.totalorder %s904_s10, %s900_s30  ;;  %p240_p4 = scmp.eq.s32.totalorder %s732_s14, 1 }
   0x8   : > { %s1008_s18 = scalar_select %p221_p1, %s908_s11, %s223_s16  }
   0x9   : > { %p1010_p5 = por %p234_p2, %p233_p0  ;;  %p1014_p6 = por %p240_p4, %p239_p3 }
   0xa   : > { %p735_p7 = scmp.ge.s32.totalorder %s912_s12, 1  ;;  %p291_p8 = scmp.lt.s32.totalorder %s912_s12, 3 }
   0xc   : > { %p292_p9 = pnand %p735_p7, %p291_p8 }
   0xd   : > { %s737_s21 = sshll.u32 (!%p292_p9), %s993_s13, 1  ;;  %s915_s14 = smov (!%p292_p9), 16  }
   0xe   : > { %295 = sbr.rel (%p292_p9) target bundleno = 836 (0x344), region = 56  ;;  %p328_p10 = scmp.lt.s32.totalorder (!%p292_p9), %s737_s21, 3 }
   0xf   : > { %s916_s16 = smov (!%p292_p9), 112   ;;  %s919_s22 = smov (!%p292_p9), 1  }
  0x10   : > { %s324_s17 = sand.u32 (!%p292_p9), 1, %s904_s10   ;;  %s776_s23 = sshll.u32 (!%p292_p9), %s993_s13, 4 }
  0x11   : > { %s666_s26 = scalar_lea.hbm (!%p292_p9), %s1128_s9, %s776_s23  ;;  %s655_s13 = scalar_lea.sflag (!%p292_p9), [#allocation3], %s324_s17 }
  0x12   : > { %s669_s28 = sshll.u32 (!%p292_p9), %s666_s26, 4  ;;  %s670_s28 = int_to_ptr.hbm [resolvable:$true] %s669_s28 }
  0x13   : > { %v914_v0 = vmov 0   ;;  %v360_v1 = vld [vmem:[%s1121_s2] sm:$0xff]  ;;  %s1136_s21 = smov (!%p328_p10, %s737_s21), 3  ;;  %vm370_vm0 = vcmask 1041408   ;;  %vm366_vm1 = vcmask 31744   ;;  %v563_v21 = vld [vmem:[%s1127_s8 + $0x10] sm:$0xff]  ;;  %v336_v24 = vlaneseq }
  0x14   : > { %827 = vset.pattern.permute.xlu0 %v914_v0  ;;  %838 = vset.pattern.permute.xlu1 %v914_v0  ;;  %s738_s24 = sshll.u32 %s1136_s21, 2  ;;  %v351_v9 = vld [vmem:[%s1120_s1] sm:$0xf]  ;;  %v564_v26 = vld [vmem:[%s1127_s8 + $0x18] sm:$0xff]  ;;  %vm446_vm4 = vcmask 1043456   ;;  %vm917_vm7 = vmmov 1  }
  0x15   : > { %363 = vperm.xlu0 %827, %v360_v1   ;;  %849 = vset.pattern.permute.xlu2 %v914_v0  ;;  %s331_s27 = scalar_lea.vmem %s1119_s0, %s738_s24  ;;  %v512_v20 = vld [vmem:[%s1125_s6] sm:$0xff]  ;;  %v1043_v25 = vand.u32 127, %v336_v24  ;;  %vm442_vm9 = vcmask 195584   ;;  %s918_s21 = smov 127  }
  0x16   : > { %v335_v2 = vld [vmem:[%s331_s27] sm:$0xff]  ;;  %s864_s29 = sshra.s32 %s670_s28, 4  ;;  %s870_s24 = scalar_lea.hbm %s1128_s9, 128  ;;  %s865_s29 = int_to_ptr.hbm [resolvable:$true] %s864_s29 }
  0x17   : > { %353 = vst [vmem:[#allocation1] ss:$2 sm:$0xff] %v335_v2  ;;  %v436_v22 = vld [vmem:[%s1123_s4] sm:$0xff]  ;;  %v338_v27 = vadd.s32 128, %v1043_v25  ;;  %vm422_vm2 = vcmp.lt.s32.totalorder %v1043_v25, 112  ;;  %v339_v33 = vand.u32 255, %v1043_v25  ;;  %p871_p0 = scmp.lt.s32.totalorder %s865_s29, %s1128_s9 }
  0x18   : > { %v561_v23 = vld [vmem:[%s1127_s8] sm:$0xff]  ;;  %vm409_vm5 = vcmp.lt.s32.totalorder %v1043_v25, 16  ;;  %vm498_vm10 = vcmp.lt.s32.totalorder %v1043_v25, 127  ;;  %vm485_vm14 = vcmp.lt.s32.totalorder %v1043_v25, 1 }
  0x19   : > { %v340_v28 = vand.u32 255, %v338_v27  ;;  %vm777_vm6 = vcmp.ge.s32.totalorder %v339_v33, 16  ;;  %v431_v47 = vld [vmem:[%s1122_s3] sm:$0xf]  ;;  %v341_v59 = vand.u32 15, %v339_v33 }
  0x1a   : > { %vm742_vm8 = vmpackc.low %vm917_vm7, %vm777_vm6  ;;  %v774_v27 = vld [vmem:[%s1126_s7] sm:$0xff] }
  0x1b   : > { %vm346_vm3 = vcmp.ge.s32.totalorder %v340_v28, 240  ;;  %v342_v58 = vand.u32 15, %v340_v28  ;;  %vm349_vm11 = vcmp.eq.s32.totalorder %v341_v59, 15  ;;  %vm778_vm13 = vcmp.ne.s32.totalorder %v341_v59, 0 }
  0x1d   : > { %vm350_vm12 = vcmp.eq.s32.totalorder %v342_v58, 15  ;;  %vm779_vm15 = vcmp.ne.s32.totalorder %v342_v58, 0 }
  0x1e   : > { %v354_v3 = vld.sshfl [vmem:[#allocation1] sm:$0xff pattern:$0x75316420]  ;;  %v355_v4 = vld.sshfl [vmem:[#allocation1 + $0x8] sm:$0xff pattern:$0x75316420] }
  0x1f   : > { %v358_v5 = vpack.c.bf16 %v354_v3, %v354_v3  ;;  %v359_v6 = vpack.c.bf16 %v355_v4, %v355_v4 }
  0x21   : > { %v372_v7 = vsel %vm370_vm0, %v358_v5, 0  ;;  %v375_v8 = vsel %vm370_vm0, %v359_v6, 0  ;;  %vm748_vm0 = vmpackc.low %vm917_vm7, %vm778_vm13 }
  0x22   : > { %384 = vmatpush.bf16.msra.mxu0 %v372_v7  ;;  %397 = vmatpush.bf16.msra.mxu1 %v375_v8 }
  0x25   : > { %739 = vmatmul.msk.bf16.vlgmr.msra.gmra.mxu0 %vm366_vm1, %v351_v9  ;;  %740 = vmatmul.msk.bf16.vlgmr.msra.gmra.mxu1 %vm366_vm1, %v351_v9  ;;  %vm753_vm1 = vmpackc.low %vm917_vm7, %vm779_vm15 }
  0x87   : > { %v364_v10 = vpop.permute.xlu0 %363 }
  0xa2   : > { %v386_v11 = vpop.f32.mrf.mxu0  ;;  %v399_v12 = vpop.f32.mrf.mxu1 }
  0xa3   : > { %v387_v13 = vadd.f32 %v386_v11, %v364_v10  ;;  %v400_v14 = vadd.f32 %v399_v12, %v364_v10 }
  0xa5   : > { %v403_v15 = vmax.f32 %v387_v13, 0.0  ;;  %v404_v16 = vmax.f32 %v400_v14, 0.0  ;;  %v507_v14 = vld [vmem:[%s1124_s5] sm:$0xf] }
  0xa7   : > { %v833_v17 = vpack.i.bf16 %v404_v16, %v403_v15 }
  0xa9   : > { %834 = vrot.lane.b32.xlu1 %v833_v17, %s915_s14  ;;  %829 = vrot.lane.b32.xlu0 %v833_v17, %s916_s16  ;;  %s866_s16 = scalar_lea.hbm %s865_s29, 64 }
  0xaa   : > { %v388_v18 = vpop.f32.mrf.mxu0  ;;  %v401_v19 = vpop.f32.mrf.mxu1  ;;  %p867_p11 = scmp.ne.s32.totalorder %s865_s29, %s866_s16  ;;  %p872_p1 = scmp.lt.s32.totalorder %s870_s24, %s866_s16 }
  0xac   : > { %p868_p12 = pnand %p867_p11, %p1010_p5  ;;  %p873_p2 = por %p872_p1, %p871_p0 }
  0xae   : > { %p869_p13 = pneg %p868_p12 }
  0xb0   : > { %p874_p3 = pnand %p873_p2, %p869_p13 }
  0xb1   : > { %515 = vperm.xlu0 %827, %v512_v20   ;;  %439 = vperm.xlu1 %838, %v436_v22  }
  0xb9   : > { %577 = vperm.xlu0 %827, %v563_v21   ;;  %567 = vperm.xlu1 %838, %v561_v23  }
  0xc1   : > { %582 = vperm.xlu1 %838, %v564_v26  }
 0x11b   : > { %v835_v29 = vpop.permute.xlu1 %834  ;;  %v830_v30 = vpop.permute.xlu0 %829 }
 0x11c   : > { %v832_v31 = vunpack.i.h.bf16 %v830_v30  ;;  %v831_v32 = vunpack.i.l.bf16 %v830_v30  ;;  %v837_v34 = vunpack.i.h.bf16 %v835_v29  ;;  %v836_v35 = vunpack.i.l.bf16 %v835_v29  ;;  %v775_v30 = vld [vmem:[%s1126_s7 + $0x8] sm:$0xff] }
 0x11e   : > { %v423_v36 = vsel %vm422_vm2, %v831_v32, %v832_v31  ;;  %v424_v37 = vsel %vm422_vm2, %v832_v31, %v831_v32  ;;  %v411_v42 = vsel %vm409_vm5, %v837_v34, %v836_v35  ;;  %v410_v44 = vsel %vm409_vm5, %v836_v35, %v837_v34 }
 0x11f   : > { %v434_v38 = vpack.c.bf16 %v423_v36, %v423_v36  ;;  %v430_v39 = vsel %vm346_vm3, 0.0, %v424_v37  ;;  %v743_v45 = vpack.c.bf16 %v403_v15, %v411_v42  ;;  %v433_v46 = vpack.c.bf16 %v404_v16, %v410_v44  ;;  %v562_v15 = vld [vmem:[%s1127_s8 + $0x8] sm:$0xff] }
 0x120   : > { %v435_v40 = vpack.c.bf16 %v430_v39, %v430_v39  ;;  %vm595_vm2 = vcmask 64512  }
 0x121   : > { %v448_v41 = vsel %vm446_vm4, %v434_v38, 0 }
 0x122   : > { %459 = vmatpush.bf16.msrb.mxu0 %v448_v41  ;;  %v451_v43 = vsel %vm446_vm4, %v435_v40, 0 }
 0x123   : > { %472 = vmatpush.bf16.msrb.mxu1 %v451_v43  ;;  %v440_v48 = vpop.permute.xlu1 %439  ;;  %v516_v16 = vpop.permute.xlu0 %515 }
 0x126   : > { %744 = vmatpush.bf16.msk.msrb.mxu0 %vm742_vm8, %v743_v45 }
 0x127   : > { %473 = vmatpush.bf16.msrb.mxu1 %v433_v46 }
 0x129   : > { %745 = vmatmul.msk.bf16.vlgmr.msrb.gmra.mxu0 %vm442_vm9, %v431_v47 }
 0x12a   : > { %746 = vmatmul.msk.bf16.vlgmr.msrb.gmra.mxu1 %vm442_vm9, %v431_v47 }
 0x12b   : > { %v568_v31 = vpop.permute.xlu1 %567  ;;  %v578_v41 = vpop.permute.xlu0 %577 }
 0x133   : > { %v583_v46 = vpop.permute.xlu1 %582 }
 0x1a6   : > { %v462_v49 = vpop.f32.mrf.mxu0 }
 0x1a7   : > { %v463_v50 = vadd.f32 %v462_v49, %v440_v48  ;;  %v475_v51 = vpop.f32.mrf.mxu1 }
 0x1a8   : > { %v476_v52 = vadd.f32 %v475_v51, %v440_v48 }
 0x1a9   : > { %v479_v53 = vmax.f32 %v463_v50, 0.0 }
 0x1aa   : > { %v480_v54 = vmax.f32 %v476_v52, 0.0 }
 0x1ac   : > { %v839_v55 = vpack.i.bf16 %v480_v54, %v479_v53 }
 0x1ae   : > { %v464_v56 = vpop.f32.mrf.mxu0  ;;  %840 = vrot.lane.b32.xlu2 %v839_v55, %s918_s21  ;;  %s736_s21 = sshll.u32 %s324_s17, 6 }
 0x1af   : > { %v477_v57 = vpop.f32.mrf.mxu1 }
 0x1b6   : > { %845 = vrot.lane.b32.xlu2 %v839_v55, %s919_s22  ;;  %s326_s22 = scalar_lea.vmem [#allocation2], %s736_s21 }
 0x1b7   : > { %s667_s27 = sshll.u32 %s326_s22, 4  ;;  %s668_s27 = int_to_ptr.vmem [resolvable:$true] %s667_s27 }
 0x1be   : > { %572 = vperm.xlu2 %849, %v562_v15  }
 0x208   : > { %v841_v60 = vpop.permute.xlu2 %840 }
 0x209   : > { %v843_v61 = vunpack.i.h.bf16 %v841_v60  ;;  %v842_v62 = vunpack.i.l.bf16 %v841_v60 }
 0x20b   : > { %v499_v63 = vsel %vm498_vm10, %v842_v62, %v843_v61  ;;  %v500_v0 = vsel %vm498_vm10, %v843_v61, %v842_v62 }
 0x20c   : > { %v505_v1 = vsel %vm349_vm11, 0.0, %v499_v63  ;;  %v506_v2 = vsel %vm350_vm12, 0.0, %v500_v0 }
 0x20d   : > { %v510_v3 = vpack.c.bf16 %v505_v1, %v505_v1  ;;  %v511_v4 = vpack.c.bf16 %v506_v2, %v506_v2 }
 0x20f   : > { %v522_v5 = vsel %vm446_vm4, %v510_v3, 0  ;;  %v525_v6 = vsel %vm446_vm4, %v511_v4, 0 }
 0x210   : > { %v846_v7 = vpop.permute.xlu2 %845  ;;  %533 = vmatpush.bf16.msra.mxu0 %v522_v5  ;;  %546 = vmatpush.bf16.msra.mxu1 %v525_v6 }
 0x211   : > { %v848_v8 = vunpack.i.h.bf16 %v846_v7  ;;  %v847_v9 = vunpack.i.l.bf16 %v846_v7 }
 0x213   : > { %v486_v10 = vsel %vm485_vm14, %v847_v9, %v848_v8  ;;  %v487_v11 = vsel %vm485_vm14, %v848_v8, %v847_v9 }
 0x214   : > { %v749_v12 = vpack.c.bf16 %v479_v53, %v487_v11  ;;  %v754_v13 = vpack.c.bf16 %v480_v54, %v486_v10 }
 0x216   : > { %750 = vmatpush.bf16.msk.msra.mxu0 %vm748_vm0, %v749_v12  ;;  %755 = vmatpush.bf16.msk.msra.mxu1 %vm753_vm1, %v754_v13 }
 0x218   : > { %v573_v36 = vpop.permute.xlu2 %572 }
 0x219   : > { %751 = vmatmul.msk.bf16.vlgmr.msra.gmra.mxu0 %vm442_vm9, %v507_v14  ;;  %756 = vmatmul.msk.bf16.vlgmr.msra.gmra.mxu1 %vm442_vm9, %v507_v14 }
 0x296   : > { %v536_v17 = vpop.f32.mrf.mxu0  ;;  %v549_v18 = vpop.f32.mrf.mxu1 }
 0x297   : > { %v537_v19 = vadd.f32 %v536_v17, %v516_v16  ;;  %v550_v20 = vadd.f32 %v549_v18, %v516_v16 }
 0x299   : > { %v553_v21 = vmax.f32 %v537_v19, 0.0  ;;  %v554_v22 = vmax.f32 %v550_v20, 0.0 }
 0x29b   : > { %v559_v23 = vpack.c.bf16 %v553_v21, %v553_v21  ;;  %v560_v24 = vpack.c.bf16 %v554_v22, %v554_v22 }
 0x29d   : > { %v603_v25 = vsel %vm446_vm4, %v559_v23, 0  ;;  %v606_v26 = vsel %vm446_vm4, %v560_v24, 0 }
 0x29e   : > { %615 = vmatpush.bf16.msra.mxu2 %v603_v25  ;;  %634 = vmatpush.bf16.msra.mxu3 %v606_v26  ;;  %v538_v28 = vpop.f32.mrf.mxu0  ;;  %v551_v29 = vpop.f32.mrf.mxu1 }
 0x2a1   : > { %765 = vmatmul.msk.bf16.vlgmr.msra.gmra.mxu2 %vm595_vm2, %v774_v27  ;;  %767 = vmatmul.msk.bf16.vlgmr.msra.gmra.mxu3 %vm595_vm2, %v774_v27 }
 0x2b1   : > { %766 = vmatmul.msk.bf16.gmra.mxu2 %vm595_vm2, %v775_v30  ;;  %768 = vmatmul.msk.bf16.gmra.mxu3 %vm595_vm2, %v775_v30 }
 0x324   : > { %v617_v32 = vpop.f32.mrf.mxu2  ;;  %v636_v33 = vpop.f32.mrf.mxu3 }
 0x325   : > { %v618_v34 = vadd.f32 %v617_v32, %v568_v31  ;;  %v637_v35 = vadd.f32 %v636_v33, %v568_v31 }
 0x327   : > { %646 = vst [vmem:[%s326_s22] sm:$0xff] %v618_v34 }
 0x328   : > { %647 = vst [vmem:[%s326_s22 + $0x8] sm:$0xff] %v637_v35 }
 0x32c   : > { %v619_v37 = vpop.f32.mrf.mxu2  ;;  %v638_v38 = vpop.f32.mrf.mxu3 }
 0x32d   : > { %v620_v39 = vadd.f32 %v619_v37, %v573_v36  ;;  %v639_v40 = vadd.f32 %v638_v38, %v573_v36 }
 0x32f   : > { %648 = vst [vmem:[%s326_s22 + $0x10] sm:$0xff] %v620_v39 }
 0x330   : > { %649 = vst [vmem:[%s326_s22 + $0x18] sm:$0xff] %v639_v40 }
 0x334   : > { %v622_v42 = vpop.f32.mrf.mxu2  ;;  %v641_v43 = vpop.f32.mrf.mxu3 }
 0x335   : > { %v623_v44 = vadd.f32 %v622_v42, %v578_v41  ;;  %v642_v45 = vadd.f32 %v641_v43, %v578_v41 }
 0x337   : > { %650 = vst [vmem:[%s326_s22 + $0x20] sm:$0xff] %v623_v44 }
 0x338   : > { %651 = vst [vmem:[%s326_s22 + $0x28] sm:$0xff] %v642_v45 }
 0x33c   : > { %v624_v47 = vpop.f32.mrf.mxu2  ;;  %v643_v48 = vpop.f32.mrf.mxu3 }
 0x33d   : > { %v625_v49 = vadd.f32 %v624_v47, %v583_v46  ;;  %v644_v50 = vadd.f32 %v643_v48, %v583_v46 }
 0x33f   : > { %652 = vst [vmem:[%s326_s22 + $0x30] sm:$0xff] %v625_v49 }
 0x340   : > { %653 = vst [vmem:[%s326_s22 + $0x38] sm:$0xff] %v644_v50 }
 0x341   : > { %877 = shalt.err (!%p874_p3)
}
 0x342   : > { %s920_s17 = smov 256   ;;  %s921_s22 = smov 512  }
 0x343   : > { %780 = dma.vmem_to_hbm [thread:$0]  (%p1010_p5), %s668_s27, 1024, %s670_s28, %s655_s13, %s920_s17, %s921_s22, %s915_s14  }
 0x344 PF: > { %p786_p4 = scmp.ge.s32.totalorder %s912_s12, 2  ;;  %s684_s21 = sand.u32 1, %s900_s30  }
 0x345   : > { %s685_s29 = scalar_lea.sflag [#allocation3], %s684_s21 }
 0x346   : > { %p783_p7 = pnand %p786_p4, %p1014_p6 }
 0x348   : > { %p784_p8 = pneg %p783_p7 }
 0x34a   : > { %895 = dma.done.wait (%p784_p8), %s685_s29, 1024  }
 0x34b   : > { %897 = vsyncadd (%p784_p8), %s685_s29, 4294966272  ;;  %p19_p9 = scmp.ge.s32.totalorder %s997_s15, 4   ;;  %s1131_s30 = smov %s904_s10 }
 0x34c   : > { %s1132_s10 = smov %s908_s11  ;;  %s1133_s11 = smov %s1008_s18 }
 0x34d   : > { %s1134_s12 = smov %s997_s15  ;;  %21 = sbr.rel (!%p19_p9) target bundleno = 3 (0x3), region = 91 }
 0x352   :  { %691 = vsyncpa [#allocation3], 1 }
 0x353   :  { %693 = vsyncpa [#allocation3 + $0x1], 1 }

</bundles_post_ra>
